<compile_context>
chip_gen: v6e
topology: v6e:2x2x1
jax: 0.10.0
libtpu: 0.0.40
codegen_flags: <defaults>
</compile_context>

<pallas_src>
import math

import numpy as np
import jax
import jax.numpy as jnp
from jax.experimental import pallas as pl
from jax.experimental.pallas import tpu as pltpu


def _round_up(x, m):
    return (x + m - 1) // m * m


def _fuse_kernel(lvl_ref, old_ref, new_ref, w_ref, b_ref, out_ref):
    """One (Cout, TS) output tile: add -> 1x1 conv (matmul) -> bias -> ReLU.

    old_ref/new_ref: (Cin, TS)   activation tiles (spatial on lanes)
    w_ref:           (Cout, Cin) this tile's level weight
    b_ref:           (Cout, 1)   this tile's level bias (f32)
    out_ref:         (Cout, TS)
    """
    del lvl_ref  # only consumed by the BlockSpec index_maps
    x = (old_ref[...] + new_ref[...]).astype(w_ref.dtype)
    y = jnp.dot(w_ref[...], x, preferred_element_type=jnp.float32)  # (Cout, TS) f32 acc
    y = y + b_ref[...]
    out_ref[...] = jnp.maximum(y, 0.0).astype(out_ref.dtype)


def fuse_neck_forward(old_feas, feats, weights, biases, *,
                      tile_s=512, wire_dtype=None, vmem_limit_bytes=None):
    """FuseNeck forward.

    old_feas, feats : lists of NCHW arrays (same N, C across levels)
    weights[i]      : (Cout, Cin)  1x1 conv weight of level i
    biases[i]       : (Cout,)      conv bias of level i
    wire_dtype      : dtype used for the activation slabs in HBM (e.g.
                      jnp.bfloat16 on v5e/v6e); matmul accumulates in f32.
    """
    num_levels = len(weights)
    assert len(old_feas) == len(feats) == len(biases) == num_levels
    N, Cin = old_feas[0].shape[:2]
    Cout = weights[0].shape[0]

    dt = np.dtype(wire_dtype) if wire_dtype is not None else np.dtype(old_feas[0].dtype)

    # Spatial tile (lane axis).  >=128 for unmasked vst, clamped to the largest
    # level so tiny inputs are not over-padded.
    hws = [int(o.shape[2] * o.shape[3]) for o in old_feas]
    ts = max(128, min(int(tile_s), _round_up(max(hws), 128)))
    padded = [_round_up(hw, ts) for hw in hws]
    tiles = [p // ts for p in padded]
    n_tiles = int(sum(tiles))
    s_total = int(sum(padded))

    # Per-tile level id, scalar-prefetched into SMEM; selects the weight/bias block.
    lvl_ids = jnp.asarray(np.repeat(np.arange(num_levels, dtype=np.int32), tiles))

    # Build the (N, Cin, S_total) activation slabs: pure reshape + pad + concat
    # (layout-only XLA copies; no transposes).
    old_parts, new_parts = [], []
    for o, f, hw, p in zip(old_feas, feats, hws, padded):
        o3 = o.reshape(N, Cin, hw).astype(dt)
        f3 = f.reshape(N, Cin, hw).astype(dt)
        if p != hw:
            padcfg = ((0, 0), (0, 0), (0, p - hw))
            o3 = jnp.pad(o3, padcfg)
            f3 = jnp.pad(f3, padcfg)
        old_parts.append(o3)
        new_parts.append(f3)
    old_slab = jnp.concatenate(old_parts, axis=-1)
    new_slab = jnp.concatenate(new_parts, axis=-1)

    w_stack = jnp.stack([jnp.asarray(w) for w in weights]).astype(dt)           # (L, Cout, Cin)
    b_stack = jnp.stack([jnp.asarray(b) for b in biases]).astype(jnp.float32)   # (L, Cout)
    b_stack = b_stack.reshape(num_levels, Cout, 1)

    # Rough VMEM footprint of the pipeline (double-buffered inputs/outputs).
    est_vmem = (2 * 2 * Cin * ts * dt.itemsize        # old + new tiles, 2 buffers
                + 2 * Cout * ts * dt.itemsize         # output tile, 2 buffers
                + 2 * (Cout * Cin * dt.itemsize + Cout * 4))
    if vmem_limit_bytes is None and est_vmem > 12 * 1024 * 1024:
        # Raise v5e's 16 MiB default scoped-VMEM limit for big tiles; stay
        # comfortably under v7x's 64 MiB physical VMEM.
        vmem_limit_bytes = min(2 * est_vmem, 48 * 1024 * 1024)

    cp = dict(dimension_semantics=("parallel", "parallel"))
    if vmem_limit_bytes is not None:
        cp["vmem_limit_bytes"] = int(vmem_limit_bytes)

    out_slab = pl.pallas_call(
        _fuse_kernel,
        out_shape=jax.ShapeDtypeStruct((N, Cout, s_total), dt),
        grid_spec=pltpu.PrefetchScalarGridSpec(
            num_scalar_prefetch=1,
            grid=(N, n_tiles),
            in_specs=[
                pl.BlockSpec((None, Cin, ts), lambda n, t, lvl: (n, 0, t)),
                pl.BlockSpec((None, Cin, ts), lambda n, t, lvl: (n, 0, t)),
                # Weight/bias blocks change only at level boundaries; at large C
                # they could additionally use pipeline_mode=pl.Buffered(1) to
                # drop the second buffer (negligible at C=32).
                pl.BlockSpec((None, Cout, Cin), lambda n, t, lvl: (lvl[t], 0, 0)),
                pl.BlockSpec((None, Cout, 1), lambda n, t, lvl: (lvl[t], 0, 0)),
            ],
            out_specs=pl.BlockSpec((None, Cout, ts), lambda n, t, lvl: (n, 0, t)),
        ),
        compiler_params=pltpu.CompilerParams(**cp),
    )(lvl_ids, old_slab, new_slab, w_stack, b_stack)

    # Slice each level's unpadded spatial range back out and restore NCHW shape
    # (reshape only -- still no transposes).
    outs = []
    off = 0
    for o, hw, p in zip(old_feas, hws, padded):
        h, w = o.shape[2], o.shape[3]
        outs.append(out_slab[:, :, off:off + hw].reshape(N, Cout, h, w))
        off += p
    return outs


def _xavier_uniform(key, cout, cin):
    # 1x1 conv: fan_in = cin, fan_out = cout; weight layout (Cout, Cin).
    limit = math.sqrt(6.0 / (cin + cout))
    return jax.random.uniform(key, (cout, cin), jnp.float32, -limit, limit)


def _reference(old_feas, feats, weights, biases):
    outs = []
    for old, new, w, b in zip(old_feas, feats, weights, biases):
        x = old + new                                            # NCHW
        y = jnp.einsum("nchw,oc->nohw", x, w, precision="highest")
        y = y + b[None, :, None, None]
        outs.append(jnp.maximum(y, 0.0))
    return outs


if __name__ == "__main__":
    # Small shapes consistent with the module: num_levels=5, Cin=Cout=32,
    # batch=2, FPN-like decreasing spatial sizes.
    num_levels = 5
    in_channels = 32
    out_channels = 32
    batch = 2
    spatials = [16, 8, 4, 4, 2]

    key = jax.random.PRNGKey(0)
    keys = jax.random.split(key, 4 * num_levels)

    old_feas, feats, weights, biases = [], [], [], []
    for i in range(num_levels):
        s = spatials[i]
        old_feas.append(jax.random.normal(
            keys[4 * i + 0], (batch, in_channels, s, s), jnp.float32))
        feats.append(jax.random.normal(
            keys[4 * i + 1], (batch, in_channels, s, s), jnp.float32))
        weights.append(_xavier_uniform(keys[4 * i + 2], out_channels, in_channels))
        biases.append(0.01 * jax.random.normal(
            keys[4 * i + 3], (out_channels,), jnp.float32))

    # ---------- f32 path: exact check against the reference -----------------
    outs = fuse_neck_forward(old_feas, feats, weights, biases)
    outs = [jax.block_until_ready(o) for o in outs]
    refs = _reference(old_feas, feats, weights, biases)
    for o, r in zip(outs, refs):
        assert o.shape == r.shape
        assert float(jnp.max(jnp.abs(o - r))) < 2e-4

    # ---------- bf16-on-the-wire path (halves HBM traffic, f32 accumulation) -
    outs_bf16 = fuse_neck_forward(old_feas, feats, weights, biases,
                                  wire_dtype=jnp.bfloat16)
    outs_bf16 = [jax.block_until_ready(o) for o in outs_bf16]
    _rf = lambda xs: [x.astype(jnp.bfloat16).astype(jnp.float32) for x in xs]
    refs_bf16 = _reference(_rf(old_feas), _rf(feats), _rf(weights), biases)
    for o, r in zip(outs_bf16, refs_bf16):
        assert o.shape == r.shape
        assert float(jnp.max(jnp.abs(o.astype(jnp.float32) - r))) < 1.5e-1

    print("KERNEL_OK")
</pallas_src>

<mosaic_0001>
module attributes {stable_mosaic.version = 11 : i64} {
  func.func @_fuse_kernel(%arg0: i32, %arg1: i32, %arg2: memref<5xi32, #tpu.memory_space<smem>>, %arg3: memref<1x32x256xf32, #tpu.memory_space<vmem>>, %arg4: memref<1x32x256xf32, #tpu.memory_space<vmem>>, %arg5: memref<1x32x32xf32, #tpu.memory_space<vmem>>, %arg6: memref<1x32x1xf32, #tpu.memory_space<vmem>>, %arg7: memref<1x32x256xf32, #tpu.memory_space<vmem>>) attributes {dimension_semantics = [#tpu.dimension_semantics<parallel>, #tpu.dimension_semantics<parallel>], iteration_bounds = array<i64: 2, 5>, scalar_prefetch = 1 : i64, scratch_operands = 0 : i64, tpu.core_type = #tpu.core_type<tc>, window_params = [{transform_indices = @transform_0, window_bounds = array<i64: 1, 32, 256>}, {transform_indices = @transform_1, window_bounds = array<i64: 1, 32, 256>}, {transform_indices = @transform_2, window_bounds = array<i64: 1, 32, 32>}, {transform_indices = @transform_3, window_bounds = array<i64: 1, 32, 1>}, {transform_indices = @transform_4, window_bounds = array<i64: 1, 32, 256>}]} {
    %c0 = arith.constant 0 : index
    %c0_0 = arith.constant 0 : index
    %c0_1 = arith.constant 0 : index
    %0 = vector.load %arg3[%c0, %c0_0, %c0_1] : memref<1x32x256xf32, #tpu.memory_space<vmem>>, vector<1x32x256xf32>
    %1 = vector.shape_cast %0 : vector<1x32x256xf32> to vector<32x256xf32>
    %c0_2 = arith.constant 0 : index
    %c0_3 = arith.constant 0 : index
    %c0_4 = arith.constant 0 : index
    %2 = vector.load %arg4[%c0_2, %c0_3, %c0_4] : memref<1x32x256xf32, #tpu.memory_space<vmem>>, vector<1x32x256xf32>
    %3 = vector.shape_cast %2 : vector<1x32x256xf32> to vector<32x256xf32>
    %4 = arith.addf %1, %3 : vector<32x256xf32>
    %c0_5 = arith.constant 0 : index
    %c0_6 = arith.constant 0 : index
    %c0_7 = arith.constant 0 : index
    %5 = vector.load %arg5[%c0_5, %c0_6, %c0_7] : memref<1x32x32xf32, #tpu.memory_space<vmem>>, vector<1x32x32xf32>
    %6 = vector.shape_cast %5 : vector<1x32x32xf32> to vector<32x32xf32>
    %cst = arith.constant dense<0.000000e+00> : vector<32x256xf32>
    %7 = tpu.matmul %6, %4, %cst {dimension_numbers = #tpu.dot_dimension_numbers<[1], [0], [0], [1], [0, 0, 1, 1], [], []>} : vector<32x32xf32>, vector<32x256xf32>, vector<32x256xf32> -> vector<32x256xf32>
    %c0_8 = arith.constant 0 : index
    %c0_9 = arith.constant 0 : index
    %c0_10 = arith.constant 0 : index
    %8 = vector.load %arg6[%c0_8, %c0_9, %c0_10] : memref<1x32x1xf32, #tpu.memory_space<vmem>>, vector<1x32x1xf32>
    %9 = vector.shape_cast %8 : vector<1x32x1xf32> to vector<32x1xf32>
    %10 = vector.broadcast %9 : vector<32x1xf32> to vector<32x256xf32>
    %11 = arith.addf %7, %10 : vector<32x256xf32>
    %cst_11 = arith.constant 0.000000e+00 : f32
    %12 = vector.broadcast %cst_11 : f32 to vector<32x256xf32>
    %13 = arith.maximumf %11, %12 : vector<32x256xf32>
    %c0_12 = arith.constant 0 : index
    %c0_13 = arith.constant 0 : index
    %c0_14 = arith.constant 0 : index
    %14 = vector.load %arg7[%c0_12, %c0_13, %c0_14] : memref<1x32x256xf32, #tpu.memory_space<vmem>>, vector<1x32x256xf32>
    %15 = vector.shape_cast %14 : vector<1x32x256xf32> to vector<32x256xf32>
    %16 = vector.shape_cast %13 : vector<32x256xf32> to vector<1x32x256xf32>
    tpu.vector_store %arg7[%c0_12, %c0_13, %c0_14], %16 {strides = array<i32>} : memref<1x32x256xf32, #tpu.memory_space<vmem>>, vector<1x32x256xf32>,
    return
  }
  func.func @transform_0(%arg0: i32, %arg1: i32, %arg2: memref<5xi32, #tpu.memory_space<smem>>) -> (i32, i32, i32) {
    %c0_i32 = arith.constant 0 : i32
    %c0_i32_0 = arith.constant 0 : i32
    return %arg0, %c0_i32, %arg1 : i32, i32, i32
  }
  func.func @transform_1(%arg0: i32, %arg1: i32, %arg2: memref<5xi32, #tpu.memory_space<smem>>) -> (i32, i32, i32) {
    %c0_i32 = arith.constant 0 : i32
    %c0_i32_0 = arith.constant 0 : i32
    return %arg0, %c0_i32, %arg1 : i32, i32, i32
  }
  func.func @transform_2(%arg0: i32, %arg1: i32, %arg2: memref<5xi32, #tpu.memory_space<smem>>) -> (i32, i32, i32) {
    %0 = arith.index_cast %arg1 : i32 to index
    %1 = memref.load %arg2[%0] : memref<5xi32, #tpu.memory_space<smem>>
    %c0_i32 = arith.constant 0 : i32
    %c0_i32_0 = arith.constant 0 : i32
    %c0_i32_1 = arith.constant 0 : i32
    return %1, %c0_i32, %c0_i32_0 : i32, i32, i32
  }
  func.func @transform_3(%arg0: i32, %arg1: i32, %arg2: memref<5xi32, #tpu.memory_space<smem>>) -> (i32, i32, i32) {
    %0 = arith.index_cast %arg1 : i32 to index
    %1 = memref.load %arg2[%0] : memref<5xi32, #tpu.memory_space<smem>>
    %c0_i32 = arith.constant 0 : i32
    %c0_i32_0 = arith.constant 0 : i32
    %c0_i32_1 = arith.constant 0 : i32
    return %1, %c0_i32, %c0_i32_0 : i32, i32, i32
  }
  func.func @transform_4(%arg0: i32, %arg1: i32, %arg2: memref<5xi32, #tpu.memory_space<smem>>) -> (i32, i32, i32) {
    %c0_i32 = arith.constant 0 : i32
    %c0_i32_0 = arith.constant 0 : i32
    return %arg0, %c0_i32, %arg1 : i32, i32, i32
  }
}

</mosaic_0001>

<bundles_post_ra>
// kernel: tpu_custom_call.1
= control target key start
LH: loop header
LB: loop body
LE: loop exit
PB: predicated region body
PF: predicated region fallthrough
CT: control target
= control target key end

     0   :  { %s1259_s0 = inlined_call_operand.vmem [shape: s32[5], index: 0, kind: input, shape index: {}]   ;;  %s1260_s1 = inlined_call_operand.hbm [shape: f32[2,32,1280], index: 1, kind: input, shape index: {}]   ;;  %s1261_s2 = inlined_call_operand.hbm [shape: f32[2,32,1280], index: 2, kind: input, shape index: {}]   ;;  %s1262_s3 = inlined_call_operand.vmem [shape: f32[5,32,32], index: 3, kind: input, shape index: {}]   ;;  %s1263_s4 = inlined_call_operand.vmem [shape: f32[5,32,1], index: 4, kind: input, shape index: {}]   ;;  %s1264_s5 = inlined_call_operand.hbm [shape: f32[2,32,1280], index: 5, kind: output, shape index: {}]  }
   0x1   :  { %1270 = sst [smem:[#allocation19_spill]] %s1260_s1  ;;  %s10_s20 = sshll.u32 %s1259_s0, 4  ;;  %s11_s20 = int_to_ptr.vmem [resolvable:$true] %s10_s20 }
   0x2   :  { %s802_s21 = scalar_lea.vmem %s11_s20, 16  ;;  %p807_p1 = scmp.lt.s32.totalorder %s11_s20, %s11_s20 }
   0x3   :  { %p803_p0 = scmp.ne.s32.totalorder %s11_s20, %s802_s21  ;;  %p808_p2 = scmp.lt.s32.totalorder %s802_s21, %s802_s21 }
   0x5   :  { %p809_p3 = por %p808_p2, %p807_p1 }
   0x7   :  { %p810_p4 = pnand %p809_p3, %p803_p0 }
   0x9   :  { %813 = shalt.err (!%p810_p4)  }
   0xa   :  { %s974_s22 = smov [#allocation3]  }
   0xb   :  { %13 = dma.vmem_to_smem %s11_s20, 16, %s974_s22, [#allocation2] }
   0xc   :  { %928 = dma.done.wait [#allocation2], 16 }
   0xd   :  { %929 = vsyncadd [#allocation2], 4294967280 }
   0xe   :  { %15 = sfence }
   0xf   :  { %16 = vsyncpa [#allocation5], 0 }
  0x10   :  { %18 = vsyncpa [#allocation5 + $0x1], 0 }
  0x11   :  { %19 = vsyncpa [#allocation8], 0 }
  0x12   :  { %21 = vsyncpa [#allocation8 + $0x1], 0 }
  0x13   :  { %22 = vsyncpa [#allocation6], 0 }
  0x14   :  { %24 = vsyncpa [#allocation6 + $0x1], 0  ;;  %s1019_s0 = smov 0   ;;  %s1021_s23 = smov 0  }
  0x15   :  { %s1023_s24 = smov 0   ;;  %s1025_s25 = smov 0  }
  0x16   :  { %s1027_s26 = smov 0   ;;  %s1029_s27 = smov 0  }
  0x17   :  { %s1031_s28 = smov 0   ;;  %s1033_s29 = smov 0  }
  0x18 LB: > { %1271 = sst [smem:[#allocation14_spill]] %s964_s27  ;;  %s668_s30 = sadd.s32 4294967295, %s972_s29   ;;  %s972_s29 = sphi %s1033_s29, %s30_s29   ;;  %s968_s28 = sphi %s1031_s28, %s1288_s28   ;;  %s964_s27 = sphi %s1029_s27, %s1287_s27   ;;  %s960_s26 = sphi %s1027_s26, %s1286_s26   ;;  %s956_s25 = sphi %s1025_s25, %s1285_s25   ;;  %s952_s24 = sphi %s1023_s24, %s1291_s24   ;;  %s948_s23 = sphi %s1021_s23, %s1290_s23   ;;  %s944_s0 = sphi %s1019_s0, %s1289_s0  }
  0x19   : > { %1272 = sst [smem:[#allocation15_spill]] %s968_s28  ;;  %s669_s6 = sadd.s32 4294967294, %s972_s29  }
  0x1a   : > { %s39_s7 = sadd.s32 1, %s964_s27  ;;  %s42_s8 = sadd.s32 1, %s968_s28 }
  0x1b   : > { %p40_p5 = scmp.ge.s32.totalorder %s39_s7, 5  ;;  %s51_s9 = sadd.s32 1, %s952_s24 }
  0x1c   : > { %p58_p6 = scmp.ne.s32.totalorder %s952_s24, %s948_s23  ;;  %p59_p7 = scmp.eq.s32.totalorder %s972_s29, 0 }
  0x1d   : > { %s1293_s7 = smov (%p40_p5, %s39_s7), 0  ;;  %s1295_s8 = smov (!%p40_p5, %s42_s8), %s968_s28 }
  0x1e   : > { %1273 = sst [smem:[#allocation16_spill]] %s1293_s7  ;;  %s47_s10 = ssub.s32 %s964_s27, %s1293_s7 }
  0x1f   : > { %p1072_p8 = por %p59_p7, %p58_p6  ;;  %p44_p9 = scmp.ge.s32.totalorder %s1295_s8, 2 }
  0x20   : > { %p64_p10 = scmp.ne.s32.totalorder %s948_s23, %s944_s0  ;;  %p65_p11 = scmp.eq.s32.totalorder %s668_s30, 0 }
  0x21   : > { %p174_p12 = scmp.eq.s32.totalorder %s668_s30, 9  ;;  %s1297_s8 = smov (%p44_p9, %s1295_s8), 0 }
  0x22   : > { %1275 = sst [smem:[#allocation17_spill]] %s1297_s8  ;;  %p1080_p13 = por %p65_p11, %p64_p10 }
  0x23   : > { %p1084_p0 = por %p174_p12, %p58_p6  ;;  %s46_s14 = ssub.s32 %s968_s28, %s1297_s8 }
  0x24   : > { %p180_p1 = scmp.eq.s32.totalorder %s669_s6, 9  ;;  %s48_s15 = sor.u32 %s47_s10, %s46_s14 }
  0x25   : > { %p49_p2 = scmp.eq.s32.totalorder %s48_s15, 0  ;;  %p725_p4 = scmp.lt.s32.totalorder %s972_s29, 10 }
  0x26   : > { %p1090_p3 = por %p180_p1, %p64_p10  ;;  %s1096_s17 = sand.u32 1, %s952_s24  }
  0x27   : > { %s1099_s18 = scalar_select %p49_p2, %s952_s24, %s51_s9  }
  0x28   : > { %s1267_s19 = sshll.u32 %s1096_s17, 6  ;;  %s673_s20 = sshll.u32 %s964_s27, 1 }
  0x29   : > { %1279 = sst [smem:[#allocation18_spill]] %s1099_s18  ;;  %s705_s21 = smul.u32 40, %s968_s28 }
  0x2a   : > { %s204_s22 = scalar_lea.vmem [#allocation4], %s1267_s19  ;;  %p1108_p5 = pnand %p725_p4, %p1072_p8 }
  0x2b   : > { %s213_s30 = sshll.u32 %s204_s22, 4  ;;  %s210_s10 = sadd.s32 %s705_s21, %s673_s20  ;;  %s214_s30 = int_to_ptr.vmem [resolvable:$true] %s213_s30 }
  0x2c   : > { %s674_s14 = sshll.u32 %s210_s10, 7  ;;  %s1281_s1 = sld [smem:[#allocation19_spill]] }
  0x2d   : > { %p678_p6 = scmp.ge.s32.totalorder %s972_s29, 1  ;;  %s201_s7 = scalar_lea.sflag [#allocation5], %s1096_s17 }
  0x2e   : > { %p816_p7 = pneg %p1108_p5  ;;  %s827_s19 = scalar_lea.vmem %s214_s30, 1024 }
  0x2f   : > { %p828_p9 = scmp.ne.s32.totalorder %s214_s30, %s827_s19  ;;  %s975_s11 = smov [#allocation4]  }
  0x30   : > { %s832_s22 = sshll.u32 %s975_s11, 4  ;;  %s833_s22 = int_to_ptr.vmem [resolvable:$false] %s832_s22 }
  0x31   : > { %p830_p8 = pnand %p828_p9, %p816_p7  ;;  %s834_s28 = scalar_lea.vmem %s833_s22, 2048 }
  0x32   : > { %s212_s9 = scalar_lea.hbm %s1281_s1, %s674_s14  ;;  %p835_p11 = scmp.lt.s32.totalorder %s214_s30, %s833_s22 }
  0x33   : > { %p831_p10 = pneg %p830_p8  ;;  %p836_p12 = scmp.lt.s32.totalorder %s834_s28, %s827_s19 }
  0x35   : > { %p837_p1 = por %p836_p12, %p835_p11 }
  0x37   : > { %p838_p2 = pnand %p837_p1, %p831_p10 }
  0x39   : > { %841 = shalt.err (!%p838_p2)
}
  0x3a   : > { %s976_s8 = smov 1280   ;;  %s977_s20 = smov 256  }
  0x3b   : > { %s978_s21 = smov 16   ;;  %p264_p4 = scmp.lt.s32.totalorder %s972_s29, 11 }
  0x3c   : > { %717 = dma.hbm_to_vmem [thread:$0]  (!%p1108_p5), %s212_s9, 1024, %s214_s30, %s201_s7, %s976_s8, %s977_s20, %s978_s21  }
  0x3d   : > { %s235_s11 = scalar_lea.hbm %s1261_s2, %s674_s14  ;;  %p1130_p9 = pnand %p678_p6, %p264_p4 }
  0x3e   : > { %s1283_s19 = sshll.u32 %s1096_s17, 6  ;;  %s224_s27 = scalar_lea.sflag [#allocation8], %s1096_s17 }
  0x3f   : > { %s227_s22 = scalar_lea.vmem [#allocation7], %s1283_s19  ;;  %s979_s7 = smov [#allocation7]  }
  0x40   : > { %s236_s1 = sshll.u32 %s227_s22, 4  ;;  %s860_s30 = sshll.u32 %s979_s7, 4  ;;  %s237_s1 = int_to_ptr.vmem [resolvable:$true] %s236_s1  ;;  %s861_s30 = int_to_ptr.vmem [resolvable:$false] %s860_s30 }
  0x41   : > { %s855_s18 = scalar_lea.vmem %s237_s1, 1024  ;;  %s862_s14 = scalar_lea.vmem %s861_s30, 2048 }
  0x42   : > { %p856_p8 = scmp.ne.s32.totalorder %s237_s1, %s855_s18  ;;  %p863_p12 = scmp.lt.s32.totalorder %s237_s1, %s861_s30 }
  0x43   : > { %p864_p6 = scmp.lt.s32.totalorder %s862_s14, %s855_s18 }
  0x44   : > { %p858_p10 = pnand %p856_p8, %p816_p7 }
  0x45   : > { %p865_p1 = por %p864_p6, %p863_p12 }
  0x46   : > { %p859_p11 = pneg %p858_p10 }
  0x48   : > { %p866_p2 = pnand %p865_p1, %p859_p11 }
  0x4a   : > { %869 = shalt.err (!%p866_p2)
}
  0x4b   : > { %720 = dma.hbm_to_vmem [thread:$0]  (!%p1108_p5), %s235_s11, 1024, %s237_s1, %s224_s27, %s976_s8, %s977_s20, %s978_s21  }
  0x4c   : > { %268 = sbr.rel (%p1130_p9) target bundleno = 314 (0x13a), region = 36  ;;  %s1145_s17 = sand.u32 (!%p1130_p9), 1, %s948_s23  }
  0x4d   : > { %s1148_s9 = sshll.u32 (!%p1130_p9), %s1145_s17, 6  ;;  %s271_s10 = scalar_lea.sflag (!%p1130_p9), [#allocation5], %s1145_s17 }
  0x4e   : > { %s1152_s18 = scalar_lea.vmem (!%p1130_p9), [#allocation4], %s1148_s9 }
  0x51   : > { %931 = dma.done.wait (%p1080_p13), %s271_s10, 1024  }
  0x52   : > { %933 = vsyncadd (%p1080_p13), %s271_s10, 4294966272  ;;  %s280_s1 = scalar_lea.sflag [#allocation8], %s1145_s17  ;;  %s1160_s27 = scalar_lea.vmem [#allocation7], %s1148_s9 }
  0x53   : > { %935 = dma.done.wait (%p1080_p13), %s280_s1, 1024  }
  0x54   : > { %937 = vsyncadd (%p1080_p13), %s280_s1, 4294966272  ;;  %v980_v0 = vmov 0.0   ;;  %s327_s6 = sld [smem:[#allocation3 + %s956_s25]]  ;;  %v981_v1 = vmov 0   ;;  %v349_v2 = vld [vmem:[%s1152_s18 + $0x38] sm:$0xff]  ;;  %v348_v4 = vld [vmem:[%s1152_s18 + $0x30] sm:$0xff] }
  0x55   : > { %471 = vmatprep.mubr.f32.mxu0 %v980_v0  ;;  %483 = vmatprep.mubr.f32.mxu1 %v980_v0  ;;  %s334_s12 = sld [smem:[#allocation3 + %s956_s25]]  ;;  %v357_v3 = vld [vmem:[%s1160_s27 + $0x38] sm:$0xff]  ;;  %v356_v6 = vld [vmem:[%s1160_s27 + $0x30] sm:$0xff]  ;;  %v347_v7 = vld [vmem:[%s1152_s18 + $0x28] sm:$0xff]  ;;  %vm394_vm0 = vcmask 261120   ;;  %s707_s7 = smul.u32 40, %s960_s26 }
  0x56   : > { %801 = vset.pattern.permute.xlu1 %v981_v1  ;;  %800 = vset.pattern.permute.xlu0 %v981_v1  ;;  %v365_v5 = vadd.f32 %v357_v3, %v349_v2  ;;  %v355_v8 = vld [vmem:[%s1160_s27 + $0x28] sm:$0xff]  ;;  %v364_v9 = vadd.f32 %v356_v6, %v348_v4  ;;  %v346_v11 = vld [vmem:[%s1152_s18 + $0x20] sm:$0xff]  ;;  %v345_v13 = vld [vmem:[%s1152_s18 + $0x18] sm:$0xff]  ;;  %s691_s30 = sshll.u32 %s956_s25, 1  ;;  %s324_s10 = scalar_lea.vmem [#allocation9], %s1148_s9 }
  0x57   : > { %v363_v10 = vadd.f32 %v355_v8, %v347_v7  ;;  %v354_v12 = vld [vmem:[%s1160_s27 + $0x20] sm:$0xff]  ;;  %v353_v15 = vld [vmem:[%s1160_s27 + $0x18] sm:$0xff]  ;;  %v344_v16 = vld [vmem:[%s1152_s18 + $0x10] sm:$0xff]  ;;  %s525_s14 = sadd.s32 %s707_s7, %s691_s30 }
  0x58   : > { %431 = vmatprep.subr.mxu0 %v365_v5  ;;  %697 = vmatprep.subr.mxu1 %v365_v5  ;;  %v362_v14 = vadd.f32 %v354_v12, %v346_v11  ;;  %v352_v17 = vld [vmem:[%s1160_s27 + $0x10] sm:$0xff]  ;;  %v361_v18 = vadd.f32 %v353_v15, %v345_v13  ;;  %v343_v20 = vld [vmem:[%s1152_s18 + $0x8] sm:$0xff]  ;;  %v342_v22 = vld [vmem:[%s1152_s18] sm:$0xff]  ;;  %s528_s18 = sshll.u32 %s324_s10, 4  ;;  %s692_s25 = sshll.u32 %s525_s14, 7  ;;  %s1201_s18 = int_to_ptr.vmem [resolvable:$true] %s528_s18 }
  0x59   : > { %432 = vmatpush1.msra.mxu0 %v364_v9  ;;  %701 = vmatpush1.msra.mxu1 %v364_v9  ;;  %v360_v19 = vadd.f32 %v352_v17, %v344_v16  ;;  %v351_v21 = vld [vmem:[%s1160_s27 + $0x8] sm:$0xff]  ;;  %v350_v24 = vld [vmem:[%s1160_s27] sm:$0xff]  ;;  %s1206_s1 = scalar_lea.hbm %s1264_s5, %s692_s25  ;;  %s513_s27 = scalar_lea.sflag [#allocation6], %s1145_s17 }
  0x5a   : > { %p328_p13 = scmp.lt.s32.totalorder %s327_s6, 4  ;;  %433 = vmatprep.subr.mxu0 %v363_v10  ;;  %698 = vmatprep.subr.mxu1 %v363_v10  ;;  %v359_v23 = vadd.f32 %v351_v21, %v343_v20  ;;  %v358_v25 = vadd.f32 %v350_v24, %v342_v22 }
  0x5b   : > { %p335_p5 = scmp.lt.s32.totalorder %s334_s12, 4  ;;  %434 = vmatpush1.msra.mxu0 %v362_v14  ;;  %702 = vmatpush1.msra.mxu1 %v362_v14 }
  0x5c   : > { %s1299_s6 = smov (!%p328_p13, %s327_s6), 4  ;;  %435 = vmatprep.subr.mxu0 %v361_v18  ;;  %699 = vmatprep.subr.mxu1 %v361_v18 }
  0x5d   : > { %s1301_s12 = smov (!%p335_p5, %s334_s12), 4  ;;  %s695_s8 = sshll.u32 %s1299_s6, 5  ;;  %436 = vmatpush1.msra.mxu0 %v360_v19  ;;  %703 = vmatpush1.msra.mxu1 %v360_v19 }
  0x5e   : > { %s332_s15 = scalar_lea.vmem %s1262_s3, %s695_s8  ;;  %s696_s11 = sshll.u32 %s1301_s12, 5  ;;  %437 = vmatprep.subr.mxu0 %v359_v23  ;;  %700 = vmatprep.subr.mxu1 %v359_v23 }
  0x5f   : > { %s339_s22 = scalar_lea.vmem %s1263_s4, %s696_s11  ;;  %v366_v26 = vld [vmem:[%s332_s15] sm:$0xff]  ;;  %v368_v27 = vld [vmem:[%s332_s15 + $0x10] sm:$0xff]  ;;  %438 = vmatpush1.msra.mxu0 %v358_v25  ;;  %704 = vmatpush1.msra.mxu1 %v358_v25  ;;  %v367_v30 = vld [vmem:[%s332_s15 + $0x8] sm:$0xff]  ;;  %s870_s6 = scalar_lea.vmem %s1201_s18, 1024 }
  0x60   : > { %v372_v28 = vld [vmem:[%s339_s22 + $0x10] sm:$0xff]  ;;  %v370_v29 = vld [vmem:[%s339_s22] sm:$0xff]  ;;  %686 = vmatmul.mubr.msk.f32.vlgmr.msra.gmra.mxu0 %vm394_vm0, %v366_v26  ;;  %688 = vmatmul.mubr.msk.f32.vlgmr.msra.gmra.mxu1 %vm394_vm0, %v368_v27  ;;  %v369_v31 = vld [vmem:[%s332_s15 + $0x18] sm:$0xff]  ;;  %p871_p7 = scmp.ne.s32.totalorder %s1201_s18, %s870_s6  ;;  %s982_s12 = smov [#allocation9]  }
  0x61   : > { %477 = vmatprep.mubr.f32.mxu0 %v980_v0  ;;  %489 = vmatprep.mubr.f32.mxu1 %v980_v0  ;;  %v373_v32 = vld [vmem:[%s339_s22 + $0x18] sm:$0xff]  ;;  %v371_v33 = vld [vmem:[%s339_s22 + $0x8] sm:$0xff]  ;;  %s874_s8 = sshll.u32 %s982_s12, 4  ;;  %s875_s8 = int_to_ptr.vmem [resolvable:$false] %s874_s8 }
  0x62   : > { %386 = vperm.xlu1 %801, %v372_v28   ;;  %376 = vperm.xlu0 %800, %v370_v29   ;;  %p872_p4 = pnand %p871_p7, %p1084_p0  ;;  %s876_s20 = scalar_lea.vmem %s875_s8, 2048 }
  0x63   : > { %p877_p8 = scmp.lt.s32.totalorder %s1201_s18, %s875_s8  ;;  %p878_p10 = scmp.lt.s32.totalorder %s876_s20, %s870_s6 }
  0x64   : > { %687 = vmatmul.mubr.msk.f32.gmra.mxu0 %vm394_vm0, %v367_v30  ;;  %689 = vmatmul.mubr.msk.f32.gmra.mxu1 %vm394_vm0, %v369_v31  ;;  %p873_p9 = pneg %p872_p4 }
  0x65   : > { %p879_p11 = por %p878_p10, %p877_p8 }
  0x66   : > { %391 = vperm.xlu1 %801, %v373_v32   ;;  %381 = vperm.xlu0 %800, %v371_v33  }
  0x67   : > { %p880_p12 = pnand %p879_p11, %p873_p9 }
  0xdd   : > { %v387_v34 = vpop.permute.xlu1 %386  ;;  %v377_v35 = vpop.permute.xlu0 %376 }
  0xe1   : > { %v392_v44 = vpop.permute.xlu1 %391  ;;  %v382_v45 = vpop.permute.xlu0 %381 }
 0x120   : > { %v473_v36 = vpop.f32.mrf.mxu0  ;;  %v485_v37 = vpop.f32.mrf.mxu1 }
 0x121   : > { %v474_v38 = vadd.f32 %v473_v36, %v377_v35  ;;  %v486_v39 = vadd.f32 %v485_v37, %v387_v34 }
 0x122   : > { %v475_v40 = vpop.f32.mrf.mxu0  ;;  %v487_v41 = vpop.f32.mrf.mxu1 }
 0x123   : > { %v496_v42 = vmax.f32 %v474_v38, 0.0  ;;  %v500_v43 = vmax.f32 %v486_v39, 0.0  ;;  %v476_v46 = vadd.f32 %v475_v40, %v377_v35  ;;  %v488_v47 = vadd.f32 %v487_v41, %v387_v34 }
 0x124   : > { %v479_v48 = vpop.f32.mrf.mxu0  ;;  %v491_v49 = vpop.f32.mrf.mxu1 }
 0x125   : > { %504 = vst [vmem:[%s324_s10] sm:$0xff] %v496_v42  ;;  %508 = vst [vmem:[%s324_s10 + $0x20] sm:$0xff] %v500_v43  ;;  %v497_v50 = vmax.f32 %v476_v46, 0.0  ;;  %v501_v51 = vmax.f32 %v488_v47, 0.0  ;;  %v480_v52 = vadd.f32 %v479_v48, %v382_v45  ;;  %v492_v53 = vadd.f32 %v491_v49, %v392_v44 }
 0x126   : > { %v481_v54 = vpop.f32.mrf.mxu0  ;;  %v493_v55 = vpop.f32.mrf.mxu1 }
 0x127   : > { %505 = vst [vmem:[%s324_s10 + $0x8] sm:$0xff] %v497_v50  ;;  %509 = vst [vmem:[%s324_s10 + $0x28] sm:$0xff] %v501_v51  ;;  %v498_v56 = vmax.f32 %v480_v52, 0.0  ;;  %v502_v57 = vmax.f32 %v492_v53, 0.0  ;;  %v482_v58 = vadd.f32 %v481_v54, %v382_v45  ;;  %v494_v59 = vadd.f32 %v493_v55, %v392_v44 }
 0x129   : > { %506 = vst [vmem:[%s324_s10 + $0x10] sm:$0xff] %v498_v56  ;;  %510 = vst [vmem:[%s324_s10 + $0x30] sm:$0xff] %v502_v57  ;;  %v499_v60 = vmax.f32 %v482_v58, 0.0  ;;  %v503_v61 = vmax.f32 %v494_v59, 0.0 }
 0x12b   : > { %507 = vst [vmem:[%s324_s10 + $0x18] sm:$0xff] %v499_v60  ;;  %511 = vst [vmem:[%s324_s10 + $0x38] sm:$0xff] %v503_v61 }
 0x12c   : > { %883 = shalt.err (!%p880_p12)
}
 0x12d   : > { %s884_s21 = scalar_lea.hbm %s1206_s1, 1024  ;;  %s888_s28 = scalar_lea.hbm %s1264_s5, 10240 }
 0x12e   : > { %p885_p6 = scmp.ne.s32.totalorder %s1206_s1, %s884_s21  ;;  %p889_p13 = scmp.lt.s32.totalorder %s1206_s1, %s1264_s5 }
 0x12f   : > { %p890_p5 = scmp.lt.s32.totalorder %s888_s28, %s884_s21 }
 0x130   : > { %p886_p1 = pnand %p885_p6, %p1084_p0 }
 0x131   : > { %p891_p7 = por %p890_p5, %p889_p13 }
 0x132   : > { %p887_p2 = pneg %p886_p1 }
 0x134   : > { %p892_p4 = pnand %p891_p7, %p887_p2 }
 0x136   : > { %895 = shalt.err (!%p892_p4)
}
 0x137   : > { %s983_s7 = smov 256   ;;  %s984_s30 = smov 1280  }
 0x138   : > { %s985_s14 = smov 16  }
 0x139   : > { %712 = dma.vmem_to_hbm [thread:$0]  (%p1084_p0), %s1201_s18, 1024, %s1206_s1, %s513_s27, %s983_s7, %s984_s30, %s985_s14  }
 0x13a PF: > { %p726_p9 = scmp.ge.s32.totalorder %s972_s29, 2  ;;  %s543_s10 = sand.u32 1, %s944_s0  }
 0x13b   : > { %s544_s25 = scalar_lea.sflag [#allocation6], %s543_s10 }
 0x13c   : > { %p722_p8 = pnand %p726_p9, %p1090_p3 }
 0x13e   : > { %p723_p10 = pneg %p722_p8 }
 0x140   : > { %939 = dma.done.wait (%p723_p10), %s544_s25, 1024  }
 0x141   : > { %941 = vsyncadd (%p723_p10), %s544_s25, 4294966272  ;;  %s30_s29 = sadd.s32 1, %s972_s29   ;;  %s1284_s13 = sld [smem:[#allocation18_spill]] }
 0x142   : > { %p27_p11 = scmp.ge.s32.totalorder %s30_s29, 12   ;;  %s1285_s25 = sld [smem:[#allocation14_spill]] }
 0x143   : > { %s1286_s26 = sld [smem:[#allocation15_spill]]  ;;  %s1289_s0 = smov %s948_s23 }
 0x144   : > { %s1287_s27 = sld [smem:[#allocation16_spill]]  ;;  %s1290_s23 = smov %s952_s24 }
 0x145   : > { %s1288_s28 = sld [smem:[#allocation17_spill]]  ;;  %29 = sbr.rel (!%p27_p11) target bundleno = 24 (0x18), region = 100 }
 0x147   : > { %s1291_s24 = smov %s1284_s13 }
 0x14a   :  { %549 = vsyncpa [#allocation5], 1 }
 0x14b   :  { %551 = vsyncpa [#allocation5 + $0x1], 1 }
 0x14c   :  { %552 = vsyncpa [#allocation8], 1 }
 0x14d   :  { %554 = vsyncpa [#allocation8 + $0x1], 1 }
 0x14e   :  { %555 = vsyncpa [#allocation6], 1 }
 0x14f   :  { %557 = vsyncpa [#allocation6 + $0x1], 1 }

</bundles_post_ra>
